<compile_context>
chip_gen: v7x
topology: tpu7x:2x2x1
jax: 0.10.0
libtpu: 0.0.40
codegen_flags: <defaults>
</compile_context>

<pallas_src>
import math

import jax
import jax.numpy as jnp
from jax.experimental import pallas as pl
from jax.experimental.pallas import tpu as pltpu

# Logical sizes (from the PyTorch module) and 128-lane padded sizes.
F_IN, D1, D2, D3 = 785, 120, 84, 10
KP, N1, N2, N3 = 896, 128, 128, 128          # 785 -> 896, 120/84/10 -> 128


def _pick_tile_m(b):
    """Batch tile (rows per grid step).

    Multiple of 8 (f32 sublane) unless the whole batch is smaller than 8, in
    which case a single block spans the full batch (block dim == array dim is
    allowed).  Prefer the largest tile that still leaves >= 2 grid steps so
    both v7x TensorCores get work; cap at 1024 so the double-buffered f32 x
    block (~6 MiB) stays inside every generation's scoped VMEM budget.
    """
    if b <= 8:
        return b
    for t in (1024, 512, 256, 128, 64, 32, 16, 8):
        if b >= 2 * t:
            return t
    return 8


# ---------------------------------------------------------------------------
# Kernel: one batch tile -> full 3-layer MLP, everything VMEM resident.
#   x_ref : (tm, 785) f32    raw input tile (no host padding / casting)
#   w*_ref: bf16 folded/padded weights (biases already inside, see prepare_params)
#   o_ref : (tm, 128) f32    padded output tile (cols 0..9 are the real logits)
#   xp_ref: (tm, 896) bf16   staging scratch: [x | 1 | 0 ... 0]
# ---------------------------------------------------------------------------
def _basicnet_kernel(x_ref, w1_ref, w2_ref, w3_ref, o_ref, xp_ref):
    tm = xp_ref.shape[0]

    # Stage the raw tile into the lane-padded bf16 buffer.  First write the
    # last (aligned) 128-lane group with the constant bias-lane pattern
    # (1 at column 785, zeros elsewhere), then overwrite columns 0..784 with
    # the real data.  Both stores start at 128-aligned lane offsets; program
    # order guarantees the overlap resolves to [x | 1 | 0...0].
    pad_group = (jax.lax.broadcasted_iota(jnp.int32, (tm, 128), 1)
                 == (F_IN - (KP - 128))).astype(jnp.bfloat16)
    xp_ref[:, KP - 128:] = pad_group
    xp_ref[:, :F_IN] = x_ref[...].astype(jnp.bfloat16)

    # fc1 -> relu -> fc2 -> relu -> fc3 (biases folded into the weights).
    h = jnp.dot(xp_ref[...], w1_ref[...], preferred_element_type=jnp.float32)
    h = jnp.maximum(h, 0.0).astype(jnp.bfloat16)
    h = jnp.dot(h, w2_ref[...], preferred_element_type=jnp.float32)
    h = jnp.maximum(h, 0.0).astype(jnp.bfloat16)
    y = jnp.dot(h, w3_ref[...], preferred_element_type=jnp.float32)
    o_ref[...] = y.astype(o_ref.dtype)


def prepare_params(params):
    """One-time weight prep (< 0.3 MiB total; run once outside the hot path).

    Returns bf16, 128-lane padded, transposed weights with biases folded in:
      w1p (896,128): rows 0..784 = W1^T, row 785 = [b1 | 1 at col 120], rest 0
      w2p (128,128): rows 0..119 = W2^T, row 120 = [b2 | 1 at col 84 ], rest 0
      w3p (128,128): rows 0..83  = W3^T, row 84  =  b3,                 rest 0
    The kernel supplies a constant 1 at x column 785; the extra 1-entries
    propagate a ones-lane through fc1/fc2 so every bias is a plain matmul row.
    """
    w1 = params["fc1"]["w"].astype(jnp.float32)
    b1 = params["fc1"]["b"].astype(jnp.float32)
    w2 = params["fc2"]["w"].astype(jnp.float32)
    b2 = params["fc2"]["b"].astype(jnp.float32)
    w3 = params["fc3"]["w"].astype(jnp.float32)
    b3 = params["fc3"]["b"].astype(jnp.float32)

    w1p = jnp.zeros((KP, N1), jnp.float32)
    w1p = w1p.at[:F_IN, :D1].set(w1.T)
    w1p = w1p.at[F_IN, :D1].set(b1)
    w1p = w1p.at[F_IN, D1].set(1.0)          # ones-lane feeding fc2's bias row

    w2p = jnp.zeros((N1, N2), jnp.float32)
    w2p = w2p.at[:D1, :D2].set(w2.T)
    w2p = w2p.at[D1, :D2].set(b2)
    w2p = w2p.at[D1, D2].set(1.0)            # ones-lane feeding fc3's bias row

    w3p = jnp.zeros((N2, N3), jnp.float32)
    w3p = w3p.at[:D2, :D3].set(w3.T)
    w3p = w3p.at[D2, :D3].set(b3)

    return (w1p.astype(jnp.bfloat16), w2p.astype(jnp.bfloat16),
            w3p.astype(jnp.bfloat16))


def basicnet_forward_prepared(x, w1p, w2p, w3p):
    """x: (B, 785) float32.  w*p: outputs of prepare_params.  Returns (B, 10)."""
    b = x.shape[0]
    tm = _pick_tile_m(b)

    out_p = pl.pallas_call(
        _basicnet_kernel,
        out_shape=jax.ShapeDtypeStruct((b, N3), jnp.float32),
        grid_spec=pltpu.PrefetchScalarGridSpec(
            num_scalar_prefetch=0,
            grid=(pl.cdiv(b, tm),),
            in_specs=[
                pl.BlockSpec((tm, F_IN), lambda i: (i, 0)),   # x tile (unpadded)
                pl.BlockSpec((KP, N1), lambda i: (0, 0)),     # w1 (+b1, ones)
                pl.BlockSpec((N1, N2), lambda i: (0, 0)),     # w2 (+b2, ones)
                pl.BlockSpec((N2, N3), lambda i: (0, 0)),     # w3 (+b3)
            ],
            out_specs=pl.BlockSpec((tm, N3), lambda i: (i, 0)),
            scratch_shapes=[pltpu.VMEM((tm, KP), jnp.bfloat16)],
        ),
        compiler_params=pltpu.CompilerParams(
            dimension_semantics=("parallel",),
            vmem_limit_bytes=32 * 1024 * 1024),
    )(x, w1p, w2p, w3p)

    return out_p[:, :D3]


def basicnet_forward(x, params):
    """Convenience wrapper: fold/pad the weights, then run the fused kernel."""
    return basicnet_forward_prepared(x, *prepare_params(params))


# ---------------------------------------------------------------------------
# Parameters (deterministic, PyTorch nn.Linear default init shapes/bounds).
# ---------------------------------------------------------------------------
def init_params(key):
    ks = iter(jax.random.split(key, 8))

    def u(k, shape, bound):
        return jax.random.uniform(k, shape, jnp.float32, -bound, bound)

    def linear(fout, fin):
        bound = 1.0 / math.sqrt(fin)
        return dict(w=u(next(ks), (fout, fin), bound),
                    b=u(next(ks), (fout,), bound))

    return dict(fc1=linear(120, 785), fc2=linear(84, 120), fc3=linear(10, 84))


# ---------------------------------------------------------------------------
# Pure-JAX f32 reference (mirrors the PyTorch module exactly) for validation.
# ---------------------------------------------------------------------------
def reference_forward(x, p):
    h = jax.nn.relu(x @ p["fc1"]["w"].T + p["fc1"]["b"])
    h = jax.nn.relu(h @ p["fc2"]["w"].T + p["fc2"]["b"])
    return h @ p["fc3"]["w"].T + p["fc3"]["b"]


if __name__ == "__main__":
    key = jax.random.PRNGKey(0)
    pkey, xkey = jax.random.split(key)
    params = init_params(pkey)

    # fc1 expects 785 input features; small batch of 2.
    x = jax.random.normal(xkey, (2, 785), jnp.float32)

    # Weight folding/padding/casting runs once, outside the per-step hot path.
    prepared = prepare_params(params)

    fwd = jax.jit(basicnet_forward_prepared)
    out = jax.block_until_ready(fwd(x, *prepared))

    ref = jax.block_until_ready(reference_forward(x, params))
    assert out.shape == (2, 10), out.shape
    assert bool(jnp.all(jnp.isfinite(out)))
    # bf16 MXU operands with f32 accumulation: loosened tolerance vs f32 ref.
    assert bool(jnp.allclose(out, ref, rtol=2e-2, atol=2e-2)), (out, ref)

    print("KERNEL_OK")
</pallas_src>

<mosaic_0001>
module attributes {stable_mosaic.version = 11 : i64} {
  func.func @_basicnet_kernel(%arg0: i32, %arg1: memref<2x785xf32, #tpu.memory_space<vmem>>, %arg2: memref<896x128xbf16, #tpu.memory_space<vmem>>, %arg3: memref<128x128xbf16, #tpu.memory_space<vmem>>, %arg4: memref<128x128xbf16, #tpu.memory_space<vmem>>, %arg5: memref<2x128xf32, #tpu.memory_space<vmem>>, %arg6: memref<2x896xbf16, #tpu.memory_space<vmem>>) attributes {dimension_semantics = [#tpu.dimension_semantics<parallel>], iteration_bounds = array<i64: 1>, scalar_prefetch = 0 : i64, scratch_operands = 1 : i64, tpu.core_type = #tpu.core_type<tc>, window_params = [{transform_indices = @transform_0, window_bounds = array<i64: 2, 785>}, {pipeline_mode = #tpu.pipeline_mode<synchronous>, transform_indices = @transform_1, window_bounds = array<i64: 896, 128>}, {pipeline_mode = #tpu.pipeline_mode<synchronous>, transform_indices = @transform_2, window_bounds = array<i64: 128, 128>}, {pipeline_mode = #tpu.pipeline_mode<synchronous>, transform_indices = @transform_3, window_bounds = array<i64: 128, 128>}, {transform_indices = @transform_4, window_bounds = array<i64: 2, 128>}]} {
    %0 = tpu.iota {dimensions = array<i32: 1>} : vector<2x128xi32>
    %c17_i32 = arith.constant 17 : i32
    %1 = vector.broadcast %c17_i32 : i32 to vector<2x128xi32>
    %2 = arith.cmpi eq, %0, %1 : vector<2x128xi32>
    %3 = arith.extui %2 : vector<2x128xi1> to vector<2x128xi32>
    %4 = arith.sitofp %3 : vector<2x128xi32> to vector<2x128xf32>
    %5 = arith.truncf %4 : vector<2x128xf32> to vector<2x128xbf16>
    %c0 = arith.constant 0 : index
    %c768 = arith.constant 768 : index
    %6 = vector.load %arg6[%c0, %c768] : memref<2x896xbf16, #tpu.memory_space<vmem>>, vector<2x128xbf16>
    tpu.vector_store %arg6[%c0, %c768], %5 {strides = array<i32>} : memref<2x896xbf16, #tpu.memory_space<vmem>>, vector<2x128xbf16>,
    %c0_0 = arith.constant 0 : index
    %c0_1 = arith.constant 0 : index
    %7 = vector.load %arg1[%c0_0, %c0_1] : memref<2x785xf32, #tpu.memory_space<vmem>>, vector<2x785xf32>
    %8 = arith.truncf %7 : vector<2x785xf32> to vector<2x785xbf16>
    %c0_2 = arith.constant 0 : index
    %c0_3 = arith.constant 0 : index
    %9 = vector.load %arg6[%c0_2, %c0_3] : memref<2x896xbf16, #tpu.memory_space<vmem>>, vector<2x785xbf16>
    tpu.vector_store %arg6[%c0_2, %c0_3], %8 {strides = array<i32>} : memref<2x896xbf16, #tpu.memory_space<vmem>>, vector<2x785xbf16>,
    %c0_4 = arith.constant 0 : index
    %c0_5 = arith.constant 0 : index
    %10 = vector.load %arg6[%c0_4, %c0_5] : memref<2x896xbf16, #tpu.memory_space<vmem>>, vector<2x896xbf16>
    %c0_6 = arith.constant 0 : index
    %c0_7 = arith.constant 0 : index
    %11 = vector.load %arg2[%c0_6, %c0_7] : memref<896x128xbf16, #tpu.memory_space<vmem>>, vector<896x128xbf16>
    %cst = arith.constant dense<0.000000e+00> : vector<2x128xf32>
    %12 = tpu.matmul %10, %11, %cst {dimension_numbers = #tpu.dot_dimension_numbers<[1], [0], [0], [1], [0, 0, 1, 1], [], []>} : vector<2x896xbf16>, vector<896x128xbf16>, vector<2x128xf32> -> vector<2x128xf32>
    %cst_8 = arith.constant 0.000000e+00 : f32
    %13 = vector.broadcast %cst_8 : f32 to vector<2x128xf32>
    %14 = arith.maximumf %12, %13 : vector<2x128xf32>
    %15 = arith.truncf %14 : vector<2x128xf32> to vector<2x128xbf16>
    %c0_9 = arith.constant 0 : index
    %c0_10 = arith.constant 0 : index
    %16 = vector.load %arg3[%c0_9, %c0_10] : memref<128x128xbf16, #tpu.memory_space<vmem>>, vector<128x128xbf16>
    %cst_11 = arith.constant dense<0.000000e+00> : vector<2x128xf32>
    %17 = tpu.matmul %15, %16, %cst_11 {dimension_numbers = #tpu.dot_dimension_numbers<[1], [0], [0], [1], [0, 0, 1, 1], [], []>} : vector<2x128xbf16>, vector<128x128xbf16>, vector<2x128xf32> -> vector<2x128xf32>
    %cst_12 = arith.constant 0.000000e+00 : f32
    %18 = vector.broadcast %cst_12 : f32 to vector<2x128xf32>
    %19 = arith.maximumf %17, %18 : vector<2x128xf32>
    %20 = arith.truncf %19 : vector<2x128xf32> to vector<2x128xbf16>
    %c0_13 = arith.constant 0 : index
    %c0_14 = arith.constant 0 : index
    %21 = vector.load %arg4[%c0_13, %c0_14] : memref<128x128xbf16, #tpu.memory_space<vmem>>, vector<128x128xbf16>
    %cst_15 = arith.constant dense<0.000000e+00> : vector<2x128xf32>
    %22 = tpu.matmul %20, %21, %cst_15 {dimension_numbers = #tpu.dot_dimension_numbers<[1], [0], [0], [1], [0, 0, 1, 1], [], []>} : vector<2x128xbf16>, vector<128x128xbf16>, vector<2x128xf32> -> vector<2x128xf32>
    %c0_16 = arith.constant 0 : index
    %c0_17 = arith.constant 0 : index
    %23 = vector.load %arg5[%c0_16, %c0_17] : memref<2x128xf32, #tpu.memory_space<vmem>>, vector<2x128xf32>
    tpu.vector_store %arg5[%c0_16, %c0_17], %22 {strides = array<i32>} : memref<2x128xf32, #tpu.memory_space<vmem>>, vector<2x128xf32>,
    return
  }
  func.func @transform_0(%arg0: i32) -> (i32, i32) {
    %c0_i32 = arith.constant 0 : i32
    %c0_i32_0 = arith.constant 0 : i32
    return %arg0, %c0_i32 : i32, i32
  }
  func.func @transform_1(%arg0: i32) -> (i32, i32) {
    %c0_i32 = arith.constant 0 : i32
    %c0_i32_0 = arith.constant 0 : i32
    %c0_i32_1 = arith.constant 0 : i32
    return %c0_i32, %c0_i32_0 : i32, i32
  }
  func.func @transform_2(%arg0: i32) -> (i32, i32) {
    %c0_i32 = arith.constant 0 : i32
    %c0_i32_0 = arith.constant 0 : i32
    %c0_i32_1 = arith.constant 0 : i32
    return %c0_i32, %c0_i32_0 : i32, i32
  }
  func.func @transform_3(%arg0: i32) -> (i32, i32) {
    %c0_i32 = arith.constant 0 : i32
    %c0_i32_0 = arith.constant 0 : i32
    %c0_i32_1 = arith.constant 0 : i32
    return %c0_i32, %c0_i32_0 : i32, i32
  }
  func.func @transform_4(%arg0: i32) -> (i32, i32) {
    %c0_i32 = arith.constant 0 : i32
    %c0_i32_0 = arith.constant 0 : i32
    return %arg0, %c0_i32 : i32, i32
  }
}

</mosaic_0001>

<bundles_post_ra>
// kernel: basicnet_forward_prepared.1
= control target key start
LH: loop header
LB: loop body
LE: loop exit
PB: predicated region body
PF: predicated region fallthrough
CT: control target
= control target key end

     0   :  { %9 = vsyncpa [#allocation4], 0  ;;  %s1684_s0 = inlined_call_operand.hbm [shape: f32[2,785], index: 0, kind: input, shape index: {}]   ;;  %s1685_s1 = inlined_call_operand.hbm [shape: bf16[896,128], index: 1, kind: input, shape index: {}]   ;;  %s1686_s2 = inlined_call_operand.hbm [shape: bf16[128,128], index: 2, kind: input, shape index: {}]   ;;  %s1687_s3 = inlined_call_operand.hbm [shape: bf16[128,128], index: 3, kind: input, shape index: {}]   ;;  %s1688_s4 = inlined_call_operand.hbm [shape: f32[2,128], index: 4, kind: output, shape index: {}]  }
   0x1   :  { %10 = vsyncpa [#allocation7], 0 }
   0x2   :  { %11 = vsyncpa [#allocation10], 0 }
   0x3   :  { %12 = vsyncpa [#allocation5], 0  ;;  %s1528_s15 = smov [#allocation6]   ;;  %s1410_s19 = scalar_lea.hbm %s1685_s1, 7168 }
   0x4   :  { %s28_s16 = sshll.u32 %s1528_s15, 4  ;;  %p1411_p0 = scmp.ne.s32.totalorder %s1685_s1, %s1410_s19  ;;  %s29_s16 = int_to_ptr.vmem [resolvable:$true] %s28_s16 }
   0x5   :  { %p1414_p1 = scmp.lt.u32.totalorder %s1410_s19, %s1685_s1 }
   0x7   :  { %p1416_p2 = pnand %p1414_p1, %p1411_p0 }
   0x9   :  { %1419 = shalt.err (!%p1416_p2)
}
   0xa   :  { %s1420_s24 = scalar_lea.vmem %s29_s16, 7168  ;;  %p1425_p4 = scmp.lt.s32.totalorder %s29_s16, %s29_s16 }
   0xb   :  { %p1421_p3 = scmp.ne.s32.totalorder %s29_s16, %s1420_s24  ;;  %p1426_p5 = scmp.lt.s32.totalorder %s1420_s24, %s1420_s24 }
   0xd   :  { %p1427_p6 = por %p1426_p5, %p1425_p4 }
   0xf   :  { %p1428_p7 = pnand %p1427_p6, %p1421_p3 }
  0x11   :  { %1431 = shalt.err (!%p1428_p7)
}
  0x12   :  { %s1529_s25 = smov 64   ;;  %s1530_s26 = smov 4  }
  0x13   :  { %34 = dma.hbm_to_vmem [thread:$0]  %s1685_s1, 7168, %s29_s16, [#allocation7], %s1529_s25, %s1529_s25, %s1530_s26  }
  0x14   :  { %s1531_s29 = smov [#allocation3]   ;;  %s1532_s5 = smov [#allocation8]  }
  0x15   :  { %s19_s30 = sshll.u32 %s1531_s29, 4  ;;  %s40_s6 = sshll.u32 %s1532_s5, 4  ;;  %s20_s30 = int_to_ptr.vmem [resolvable:$true] %s19_s30  ;;  %s41_s6 = int_to_ptr.vmem [resolvable:$true] %s40_s6 }
  0x16   :  { %s1432_s9 = scalar_lea.hbm %s1684_s0, 224 }
  0x17   :  { %p1433_p8 = scmp.ne.s32.totalorder %s1684_s0, %s1432_s9  ;;  %p1436_p9 = scmp.lt.u32.totalorder %s1432_s9, %s1684_s0 }
  0x19   :  { %p1438_p10 = pnand %p1436_p9, %p1433_p8 }
  0x1b   :  { %1441 = shalt.err (!%p1438_p10)
}
  0x1c   :  { %s1442_s1 = scalar_lea.vmem %s20_s30, 224  ;;  %p1447_p12 = scmp.lt.s32.totalorder %s20_s30, %s20_s30 }
  0x1d   :  { %p1443_p11 = scmp.ne.s32.totalorder %s20_s30, %s1442_s1  ;;  %p1448_p13 = scmp.lt.s32.totalorder %s1442_s1, %s1442_s1 }
  0x1f   :  { %p1449_p0 = por %p1448_p13, %p1447_p12 }
  0x21   :  { %p1450_p1 = pnand %p1449_p0, %p1443_p11 }
  0x23   :  { %1453 = shalt.err (!%p1450_p1)
}
  0x24   :  { %22 = dma.hbm_to_vmem [thread:$0]  %s1684_s0, 224, %s20_s30, [#allocation4]  }
  0x25   :  { %s1454_s18 = scalar_lea.hbm %s1686_s2, 1024 }
  0x26   :  { %p1455_p2 = scmp.ne.s32.totalorder %s1686_s2, %s1454_s18  ;;  %p1458_p3 = scmp.lt.u32.totalorder %s1454_s18, %s1686_s2 }
  0x28   :  { %p1460_p4 = pnand %p1458_p3, %p1455_p2 }
  0x2a   :  { %1463 = shalt.err (!%p1460_p4)
}
  0x2b   :  { %s1464_s23 = scalar_lea.vmem %s41_s6, 1024  ;;  %p1469_p6 = scmp.lt.s32.totalorder %s41_s6, %s41_s6 }
  0x2c   :  { %p1465_p5 = scmp.ne.s32.totalorder %s41_s6, %s1464_s23  ;;  %p1470_p7 = scmp.lt.s32.totalorder %s1464_s23, %s1464_s23 }
  0x2e   :  { %p1471_p8 = por %p1470_p7, %p1469_p6 }
  0x30   :  { %p1472_p9 = pnand %p1471_p8, %p1465_p5 }
  0x32   :  { %1475 = shalt.err (!%p1472_p9)
}
  0x33   :  { %46 = dma.hbm_to_vmem [thread:$0]  %s1686_s2, 1024, %s41_s6, [#allocation7], %s1529_s25, %s1529_s25, %s1530_s26  }
  0x34   :  { %s1533_s27 = smov [#allocation9]   ;;  %s1476_s5 = scalar_lea.hbm %s1687_s3, 1024 }
  0x35   :  { %s52_s28 = sshll.u32 %s1533_s27, 4  ;;  %p1477_p10 = scmp.ne.s32.totalorder %s1687_s3, %s1476_s5  ;;  %s53_s28 = int_to_ptr.vmem [resolvable:$true] %s52_s28 }
  0x36   :  { %p1480_p11 = scmp.lt.u32.totalorder %s1476_s5, %s1687_s3 }
  0x38   :  { %p1482_p12 = pnand %p1480_p11, %p1477_p10 }
  0x3a   :  { %1485 = shalt.err (!%p1482_p12)
}
  0x3b   :  { %s1486_s11 = scalar_lea.vmem %s53_s28, 1024  ;;  %p1491_p0 = scmp.lt.s32.totalorder %s53_s28, %s53_s28 }
  0x3c   :  { %p1487_p13 = scmp.ne.s32.totalorder %s53_s28, %s1486_s11  ;;  %p1492_p1 = scmp.lt.s32.totalorder %s1486_s11, %s1486_s11 }
  0x3e   :  { %p1493_p2 = por %p1492_p1, %p1491_p0 }
  0x40   :  { %p1494_p3 = pnand %p1493_p2, %p1487_p13 }
  0x42   :  { %1497 = shalt.err (!%p1494_p3)
}
  0x43   :  { %58 = dma.hbm_to_vmem [thread:$0]  %s1687_s3, 1024, %s53_s28, [#allocation10], %s1529_s25, %s1529_s25, %s1530_s26  }
  0x44   :  { %1520 = dma.done.wait [#allocation4], 224  }
  0x45   :  { %1521 = vsyncadd [#allocation4], 4294967072 }
  0x46   :  { %1522 = dma.done.wait [#allocation7], 8192  }
  0x47   :  { %1523 = vsyncadd [#allocation7], 4294959104 }
  0x48   :  { %1524 = dma.done.wait [#allocation10], 1024  }
  0x49   :  { %1525 = vsyncadd [#allocation10], 4294966272  ;;  %v72_v0 = vlaneseq  ;;  %v1534_v2 = vmov 0.0   ;;  %v1335_v5 = vld [vmem:[#allocation6 + $0x40] sm:$0xff]   ;;  %v1339_v9 = vld [vmem:[#allocation6 + $0x48] sm:$0xff]   ;;  %vm186_vm1 = vcmask 1040384  }
  0x4a   :  { %v1336_v6 = vld [vmem:[#allocation6 + $0xc0] sm:$0xff]   ;;  %1171 = vmatprep.subr.bf16.mxu0 %v1335_v5  ;;  %v1340_v10 = vld [vmem:[#allocation6 + $0xc8] sm:$0xff]   ;;  %v1343_v13 = vld [vmem:[#allocation6 + $0x50] sm:$0xff]   ;;  %vm187_vm2 = vcmask 1041409   ;;  %v1535_v27 = vmov 1983009808  }
  0x4b   :  { %v73_v1 = vand.u32 127, %v72_v0  ;;  %v1337_v7 = vld [vmem:[#allocation6] sm:$0xff]   ;;  %1193 = vmatprep.subr.bf16.mxu1 %v1336_v6  ;;  %v1341_v11 = vld [vmem:[#allocation6 + $0x8] sm:$0xff]   ;;  %v1344_v14 = vld [vmem:[#allocation6 + $0xd0] sm:$0xff]   ;;  %v85_v28 = vunpack.c.l.s4 %v1535_v27  ;;  %v88_v35 = vshrl.u32 %v72_v0, 7  ;;  %vm189_vm4 = vcmask 1042434  }
  0x4c   :  { %v1338_v8 = vld [vmem:[#allocation6 + $0x80] sm:$0xff]   ;;  %1172 = vmatpush3.bf16.msra.mxu0 %v1337_v7  ;;  %v1342_v12 = vld [vmem:[#allocation6 + $0x88] sm:$0xff]   ;;  %v1345_v15 = vld [vmem:[#allocation6 + $0x10] sm:$0xff]   ;;  %v1536_v37 = vmov 1966171168   ;;  %vm191_vm6 = vcmask 1043459  }
  0x4d   :  { %vm74_vm0 = vcmp.eq.s32.totalorder %v73_v1, 17  ;;  %1194 = vmatpush3.bf16.msra.mxu1 %v1338_v8  ;;  %1173 = vmatprep.subr.bf16.mxu0 %v1339_v9  ;;  %v1346_v16 = vld [vmem:[#allocation6 + $0x90] sm:$0xff]   ;;  %v1347_v17 = vld [vmem:[#allocation6 + $0x58] sm:$0xff]   ;;  %v1351_v21 = vld [vmem:[#allocation6 + $0x60] sm:$0xff]   ;;  %v86_v34 = vunpack.c.0.s8 %v85_v28  ;;  %v141_v38 = vunpack.c.l.s4 %v1536_v37  ;;  %vm193_vm7 = vcmask 1044484   ;;  %s1538_s3 = smov [#allocation11]  }
  0x4e   :  { %v1095_v3 = vsel %vm74_vm0, 1.0, %v1534_v2  ;;  %1195 = vmatprep.subr.bf16.mxu1 %v1340_v10  ;;  %v1348_v18 = vld [vmem:[#allocation6 + $0xd8] sm:$0xff]   ;;  %v1352_v22 = vld [vmem:[#allocation6 + $0xe0] sm:$0xff]   ;;  %v1355_v25 = vld [vmem:[#allocation6 + $0x68] sm:$0xff]   ;;  %vm195_vm10 = vcmask 1045509   ;;  %vm197_vm12 = vcmask 137222  }
  0x4f   :  { %v77_v4 = vpack.c.bf16 %v1095_v3, %v1095_v3  ;;  %v1349_v19 = vld [vmem:[#allocation6 + $0x18] sm:$0xff]   ;;  %v1353_v23 = vld [vmem:[#allocation6 + $0x20] sm:$0xff]   ;;  %v1356_v26 = vld [vmem:[#allocation6 + $0xe8] sm:$0xff]   ;;  %v89_v42 = vsub.s32 %v86_v34, %v88_v35  ;;  %v142_v44 = vunpack.c.0.s8 %v141_v38  ;;  %vm1537_vm14 = vmmov 0   ;;  %s1084_s25 = sshll.u32 %s1538_s3, 4  ;;  %s1085_s25 = int_to_ptr.vmem [resolvable:$true] %s1084_s25 }
  0x50   :  { %1174 = vmatpush3.bf16.msra.mxu0 %v1341_v11  ;;  %v1350_v20 = vld [vmem:[#allocation6 + $0x98] sm:$0xff]   ;;  %v1354_v24 = vld [vmem:[#allocation6 + $0xa0] sm:$0xff]   ;;  %v1357_v29 = vld [vmem:[#allocation6 + $0x28] sm:$0xff]   ;;  %s1498_s26 = scalar_lea.vmem %s1085_s25, 32  ;;  %p1503_p5 = scmp.lt.s32.totalorder %s1085_s25, %s1085_s25 }
  0x51   :  { %78 = vst [vmem:[#allocation2 + $0x6] sm:$0x1] %v77_v4  ;;  %1196 = vmatpush3.bf16.msra.mxu1 %v1342_v12  ;;  %1175 = vmatprep.subr.bf16.mxu0 %v1343_v13  ;;  %v1358_v30 = vld [vmem:[#allocation6 + $0xa8] sm:$0xff]   ;;  %vm1622_vm3 = vmor %vm187_vm2, %vm186_vm1  ;;  %v1359_v32 = vld [vmem:[#allocation6 + $0x70] sm:$0xff]   ;;  %v1626_v53 = vsub.s32 %v142_v44, %v88_v35  ;;  %p1499_p4 = scmp.ne.s32.totalorder %s1085_s25, %s1498_s26  ;;  %p1504_p6 = scmp.lt.s32.totalorder %s1498_s26, %s1498_s26 }
  0x52   :  { %1197 = vmatprep.subr.bf16.mxu1 %v1344_v14  ;;  %v1360_v33 = vld [vmem:[#allocation6 + $0xf0] sm:$0xff]   ;;  %v1363_v40 = vld [vmem:[#allocation6 + $0x78] sm:$0xff]   ;;  %v1370_v52 = vld [vmem:[#allocation6 + $0x140] sm:$0xff]  }
  0x53   :  { %v1361_v36 = vld [vmem:[#allocation6 + $0x30] sm:$0xff]   ;;  %v1364_v41 = vld [vmem:[#allocation6 + $0xf8] sm:$0xff]   ;;  %vm190_vm5 = vmor %vm189_vm4, %vm1622_vm3  ;;  %p1505_p7 = por %p1504_p6, %p1503_p5 }
  0x54   :  { %1176 = vmatpush3.bf16.msra.mxu0 %v1345_v15  ;;  %v1362_v39 = vld [vmem:[#allocation6 + $0xb0] sm:$0xff]   ;;  %v1365_v43 = vld [vmem:[#allocation6 + $0x38] sm:$0xff]   ;;  %vm192_vm8 = vmor %vm191_vm6, %vm190_vm5 }
  0x55   :  { %1198 = vmatpush3.bf16.msra.mxu1 %v1346_v16  ;;  %1177 = vmatprep.subr.bf16.mxu0 %v1347_v17  ;;  %v1366_v45 = vld [vmem:[#allocation6 + $0xb8] sm:$0xff]   ;;  %vm194_vm9 = vmor %vm193_vm7, %vm192_vm8  ;;  %v1371_v14 = vld [vmem:[#allocation6 + $0x100] sm:$0xff]   ;;  %p1506_p8 = pnand %p1505_p7, %p1499_p4 }
  0x56   :  { %1199 = vmatprep.subr.bf16.mxu1 %v1348_v18  ;;  %v79_v46 = vld [vmem:[#allocation3] sm:$0xff]  ;;  %v80_v47 = vld [vmem:[#allocation3 + $0x8] sm:$0x3f]  ;;  %vm196_vm11 = vmor %vm195_vm10, %vm194_vm9 }
  0x57   :  { %v83_v48 = vcombine.high %v79_v46, %v79_v46  ;;  %v90_v49 = vrot.slane %v79_v46, %v89_v42  ;;  %v100_v50 = vcombine.high %v80_v47, %v80_v47  ;;  %v107_v51 = vrot.slane %v80_v47, %v89_v42  ;;  %vm198_vm13 = vmor %vm197_vm12, %vm196_vm11  ;;  %v1373_v16 = vld [vmem:[#allocation6 + $0x148] sm:$0xff]   ;;  %v1372_v18 = vld [vmem:[#allocation6 + $0x180] sm:$0xff]  }
  0x58   :  { %1178 = vmatpush3.bf16.msra.mxu0 %v1349_v19  ;;  %v1379_v27 = vld [vmem:[#allocation6 + $0x158] sm:$0xff]   ;;  %v1378_v28 = vld [vmem:[#allocation6 + $0x190] sm:$0xff]   ;;  %v1384_v34 = vld [vmem:[#allocation6 + $0x1a0] sm:$0xff]  }
  0x59   :  { %1200 = vmatpush3.bf16.msra.mxu1 %v1350_v20  ;;  %1179 = vmatprep.subr.bf16.mxu0 %v1351_v21  ;;  %v97_v54 = vrot.slane %v83_v48, %v89_v42  ;;  %v98_v55 = vcombine.high %v90_v49, %v90_v49  ;;  %v114_v56 = vrot.slane %v100_v50, %v89_v42  ;;  %v1381_v31 = vld [vmem:[#allocation6 + $0x198] sm:$0xff]   ;;  %v1386_v35 = vld [vmem:[#allocation6 + $0x128] sm:$0xff]   ;;  %v1389_v38 = vld [vmem:[#allocation6 + $0x130] sm:$0xff]  }
  0x5a   :  { %1201 = vmatprep.subr.bf16.mxu1 %v1352_v22  ;;  %v115_v57 = vcombine.high %v107_v51, %v107_v51  ;;  %v1374_v22 = vld [vmem:[#allocation6 + $0x108] sm:$0xff]   ;;  %v1396_v47 = vld [vmem:[#allocation8 + $0x10] sm:$0xff]   ;;  %v1397_v48 = vld [vmem:[#allocation8 + $0x18] sm:$0xff]  }
  0x5b   :  { %v99_v58 = vcombine.high %v97_v54, %v97_v54  ;;  %v129_v59 = vpack.c.bf16 %v114_v56, %v114_v56  ;;  %v1096_v60 = vpack.c.bf16 %v98_v55, %v90_v49  ;;  %v1387_v37 = vld [vmem:[#allocation6 + $0x1a8] sm:$0xff]   ;;  %v1398_v49 = vld [vmem:[#allocation8 + $0x20] sm:$0xff]   ;;  %v1404_v55 = vld [vmem:[#allocation9 + $0x10] sm:$0xff]  }
  0x5c   :  { %1180 = vmatpush3.bf16.msra.mxu0 %v1353_v23  ;;  %v1098_v61 = vpack.c.bf16 %v115_v57, %v107_v51  ;;  %v1395_v46 = vld [vmem:[#allocation8 + $0x8] sm:$0xff]   ;;  %v1400_v51 = vld [vmem:[#allocation8 + $0x30] sm:$0xff]   ;;  %v1405_v56 = vld [vmem:[#allocation9 + $0x18] sm:$0xff]  }
  0x5d   :  { %1202 = vmatpush3.bf16.msra.mxu1 %v1354_v24  ;;  %1181 = vmatprep.subr.bf16.mxu0 %v1355_v25  ;;  %v1097_v62 = vpack.c.bf16 %v99_v58, %v97_v54  ;;  %v146_v63 = vrot.slane %v1096_v60, %v1626_v53  ;;  %v167_v1 = vrot.slane %v129_v59, %v1626_v53  ;;  %v1376_v24 = vld [vmem:[#allocation6 + $0x150] sm:$0xff]   ;;  %v1375_v25 = vld [vmem:[#allocation6 + $0x188] sm:$0xff]   ;;  %v1406_v57 = vld [vmem:[#allocation9 + $0x20] sm:$0xff]  }
  0x5e   :  { %1203 = vmatprep.subr.bf16.mxu1 %v1356_v26  ;;  %v160_v0 = vrot.slane %v1098_v61, %v1626_v53  ;;  %v1377_v26 = vld [vmem:[#allocation6 + $0x110] sm:$0xff]   ;;  %v1399_v50 = vld [vmem:[#allocation8 + $0x28] sm:$0xff]  }
  0x5f   :  { %v153_v3 = vrot.slane %v1097_v62, %v1626_v53  ;;  %v1403_v54 = vld [vmem:[#allocation9 + $0x8] sm:$0xff]   ;;  %v1408_v59 = vld [vmem:[#allocation9 + $0x30] sm:$0xff]  }
  0x60   :  { %1182 = vmatpush3.bf16.msra.mxu0 %v1357_v29  ;;  %v169_v4 = vcombine.low %v160_v0, %v167_v1  ;;  %v1380_v29 = vld [vmem:[#allocation6 + $0x118] sm:$0xff]   ;;  %v1407_v58 = vld [vmem:[#allocation9 + $0x28] sm:$0xff]  }
  0x61   :  { %1204 = vmatpush3.bf16.msra.mxu1 %v1358_v30  ;;  %1183 = vmatprep.subr.bf16.mxu0 %v1359_v32  ;;  %v168_v5 = vcombine.low %v146_v63, %v153_v3  ;;  %v1382_v30 = vld [vmem:[#allocation6 + $0x160] sm:$0xff]  }
  0x62   :  { %1205 = vmatprep.subr.bf16.mxu1 %v1360_v33  ;;  %v183_v6 = vrot.slane %v169_v4, %v1626_v53  ;;  %v1383_v32 = vld [vmem:[#allocation6 + $0x120] sm:$0xff]   ;;  %v1385_v33 = vld [vmem:[#allocation6 + $0x168] sm:$0xff]  }
  0x63   :  { %v176_v7 = vrot.slane %v168_v5, %v1626_v53 }
  0x64   :  { %1184 = vmatpush3.bf16.msra.mxu0 %v1361_v36  ;;  %v1388_v36 = vld [vmem:[#allocation6 + $0x170] sm:$0xff]  }
  0x65   :  { %1206 = vmatpush3.bf16.msra.mxu1 %v1362_v39  ;;  %1185 = vmatprep.subr.bf16.mxu0 %v1363_v40  ;;  %v184_v8 = vcombine.low %v176_v7, %v183_v6  ;;  %v1391_v39 = vld [vmem:[#allocation6 + $0x178] sm:$0xff]   ;;  %v1390_v40 = vld [vmem:[#allocation6 + $0x1b0] sm:$0xff]  }
  0x66   :  { %1207 = vmatprep.subr.bf16.mxu1 %v1364_v41  ;;  %v1392_v41 = vld [vmem:[#allocation6 + $0x138] sm:$0xff]  }
  0x67   :  { %199 = vst.msk [vmem:[#allocation2] sm:$0x7f] %vm198_vm13, %v184_v8 }
  0x68   :  { %1186 = vmatpush3.bf16.msra.mxu0 %v1365_v43  ;;  %v1393_v43 = vld [vmem:[#allocation6 + $0x1b8] sm:$0xff]  }
  0x69   :  { %1208 = vmatpush3.bf16.msra.mxu1 %v1366_v45  ;;  %1215 = vmatprep.subr.bf16.mxu0 %v1370_v52  ;;  %v1394_v45 = vld [vmem:[#allocation8] sm:$0xff]   ;;  %v1401_v52 = vld [vmem:[#allocation8 + $0x38] sm:$0xff]  }
  0x6a   :  { %1264 = vmatprep.subr.bf16.mxu1 %v1534_v2 }
  0x6e   :  { %v200_v9 = vld [vmem:[#allocation2] sm:$0x7f] }
  0x6f   :  { %v314_v10 = vcombine.high %v200_v9, %v200_v9  ;;  %v321_v11 = vrot.slane %v200_v9, %v1626_v53 }
  0x71   :  { %v329_v12 = vcombine.high %v321_v11, %v321_v11  ;;  %v337_v13 = vrot.slane %v321_v11, %v1626_v53  ;;  %v328_v15 = vrot.slane %v314_v10, %v1626_v53 }
  0x73   :  { %v351_v17 = vrot.slane %v329_v12, %v1626_v53  ;;  %v330_v19 = vcombine.high %v328_v15, %v328_v15  ;;  %v359_v20 = vcombine.high %v337_v13, %v337_v13  ;;  %v344_v42 = vrot.slane %v328_v15, %v1626_v53 }
  0x75   :  { %737 = vmatprep.mubr.bf16.mxu0 %v351_v17  ;;  %v361_v21 = vcombine.high %v351_v17, %v351_v17  ;;  %v358_v23 = vrot.slane %v330_v19, %v1626_v53  ;;  %v360_v44 = vcombine.high %v344_v42, %v344_v42  ;;  %v1402_v53 = vld [vmem:[#allocation9] sm:$0xff]  }
  0x76   :  { %738 = vmatmul.mubr.bf16.vlgmr.msra.gmra.mrb[0].mxu0 %v337_v13 }
  0x77   :  { %777 = vmatprep.mubr.bf16.mxu1 %v361_v21  ;;  %1216 = vmatpush3.bf16.msra.mxu0 %v1371_v14 }
  0x78   :  { %778 = vmatmul.mubr.bf16.vlgmr.msra.gmra.mrb[0].mxu1 %v359_v20  ;;  %1217 = vmatprep.subr.bf16.mxu0 %v1373_v16  ;;  %v1409_v20 = vld [vmem:[#allocation9 + $0x38] sm:$0xff]  }
  0x79   :  { %1265 = vmatpush3.bf16.msra.mxu1 %v1372_v18  ;;  %817 = vmatprep.mubr.bf16.mxu0 %v358_v23 }
  0x7a   :  { %1266 = vmatprep.subr.bf16.mxu1 %v1534_v2  ;;  %1280 = vmatprep.mubr.msk.bf16.mxu1 %vm1537_vm14, %v1534_v2 }
  0x7b   :  { %1218 = vmatpush3.bf16.msra.mxu0 %v1374_v22 }
  0x7c   :  { %1219 = vmatprep.subr.bf16.mxu0 %v1376_v24 }
  0x7d   :  { %1267 = vmatpush3.bf16.msra.mxu1 %v1375_v25 }
  0x7e   :  { %1268 = vmatprep.subr.bf16.mxu1 %v1534_v2 }
  0x7f   :  { %1220 = vmatpush3.bf16.msra.mxu0 %v1377_v26 }
  0x80   :  { %1221 = vmatprep.subr.bf16.mxu0 %v1379_v27 }
  0x81   :  { %1269 = vmatpush3.bf16.msra.mxu1 %v1378_v28 }
  0x82   :  { %1270 = vmatprep.subr.bf16.mxu1 %v1534_v2 }
  0x83   :  { %1222 = vmatpush3.bf16.msra.mxu0 %v1380_v29 }
  0x84   :  { %1223 = vmatprep.subr.bf16.mxu0 %v1382_v30 }
  0x85   :  { %1271 = vmatpush3.bf16.msra.mxu1 %v1381_v31 }
  0x86   :  { %1272 = vmatprep.subr.bf16.mxu1 %v1534_v2 }
  0x87   :  { %1224 = vmatpush3.bf16.msra.mxu0 %v1383_v32 }
  0x88   :  { %1225 = vmatprep.subr.bf16.mxu0 %v1385_v33 }
  0x89   :  { %1273 = vmatpush3.bf16.msra.mxu1 %v1384_v34 }
  0x8a   :  { %1274 = vmatprep.subr.bf16.mxu1 %v1534_v2 }
  0x8b   :  { %1226 = vmatpush3.bf16.msra.mxu0 %v1386_v35 }
  0x8c   :  { %1227 = vmatprep.subr.bf16.mxu0 %v1388_v36 }
  0x8d   :  { %1275 = vmatpush3.bf16.msra.mxu1 %v1387_v37 }
  0x8e   :  { %1276 = vmatprep.subr.bf16.mxu1 %v1534_v2 }
  0x8f   :  { %1228 = vmatpush3.bf16.msra.mxu0 %v1389_v38 }
  0x90   :  { %1229 = vmatprep.subr.bf16.mxu0 %v1391_v39 }
  0x91   :  { %1277 = vmatpush3.bf16.msra.mxu1 %v1390_v40 }
  0x92   :  { %1278 = vmatprep.subr.bf16.mxu1 %v1534_v2 }
  0x93   :  { %1230 = vmatpush3.bf16.msra.mxu0 %v1392_v41 }
  0x94   :  { %1284 = vmatprep.subr.bf16.mxu0 %v1534_v2 }
  0x95   :  { %1279 = vmatpush3.bf16.msra.mxu1 %v1393_v43 }
  0x96   :  { %818 = vmatmul.mubr.bf16.vlgmr.msra.gmra.mrb[4].mxu0 %v344_v42  ;;  %1304 = vmatprep.subr.bf16.mxu1 %v1534_v2 }
  0x97   :  { %1300 = vmatprep.mubr.msk.bf16.mxu0 %vm1537_vm14, %v1534_v2  ;;  %1285 = vmatpush3.bf16.msra.mxu0 %v1394_v45 }
  0x98   :  { %1281 = vmatmul.mubr.bf16.vlgmr.msra.gmra.mrb[4].mxu1 %v360_v44  ;;  %1286 = vmatprep.subr.bf16.mxu0 %v1534_v2 }
  0x99   :  { %1320 = vmatprep.mubr.msk.bf16.mxu1 %vm1537_vm14, %v1534_v2  ;;  %1305 = vmatpush3.bf16.msra.mxu1 %v1402_v53 }
  0x9a   :  { %1306 = vmatprep.subr.bf16.mxu1 %v1534_v2 }
  0x9b   :  { %1287 = vmatpush3.bf16.msra.mxu0 %v1395_v46 }
  0x9c   :  { %1288 = vmatprep.subr.bf16.mxu0 %v1534_v2 }
  0x9d   :  { %1307 = vmatpush3.bf16.msra.mxu1 %v1403_v54 }
  0x9e   :  { %1308 = vmatprep.subr.bf16.mxu1 %v1534_v2 }
  0x9f   :  { %1289 = vmatpush3.bf16.msra.mxu0 %v1396_v47 }
  0xa0   :  { %1290 = vmatprep.subr.bf16.mxu0 %v1534_v2 }
  0xa1   :  { %1309 = vmatpush3.bf16.msra.mxu1 %v1404_v55 }
  0xa2   :  { %1310 = vmatprep.subr.bf16.mxu1 %v1534_v2 }
  0xa3   :  { %1291 = vmatpush3.bf16.msra.mxu0 %v1397_v48 }
  0xa4   :  { %1292 = vmatprep.subr.bf16.mxu0 %v1534_v2 }
  0xa5   :  { %1311 = vmatpush3.bf16.msra.mxu1 %v1405_v56 }
  0xa6   :  { %1312 = vmatprep.subr.bf16.mxu1 %v1534_v2 }
  0xa7   :  { %1293 = vmatpush3.bf16.msra.mxu0 %v1398_v49 }
  0xa8   :  { %1294 = vmatprep.subr.bf16.mxu0 %v1534_v2 }
  0xa9   :  { %1313 = vmatpush3.bf16.msra.mxu1 %v1406_v57 }
  0xaa   :  { %1314 = vmatprep.subr.bf16.mxu1 %v1534_v2 }
  0xab   :  { %1295 = vmatpush3.bf16.msra.mxu0 %v1399_v50 }
  0xac   :  { %1296 = vmatprep.subr.bf16.mxu0 %v1534_v2 }
  0xad   :  { %1315 = vmatpush3.bf16.msra.mxu1 %v1407_v58 }
  0xae   :  { %1316 = vmatprep.subr.bf16.mxu1 %v1534_v2 }
  0xaf   :  { %1297 = vmatpush3.bf16.msra.mxu0 %v1400_v51 }
  0xb0   :  { %1298 = vmatprep.subr.bf16.mxu0 %v1534_v2 }
  0xb1   :  { %1317 = vmatpush3.bf16.msra.mxu1 %v1408_v59 }
  0xb2   :  { %1318 = vmatprep.subr.bf16.mxu1 %v1534_v2 }
  0xb3   :  { %1299 = vmatpush3.bf16.msra.mxu0 %v1401_v52 }
  0xb5   :  { %1319 = vmatpush3.bf16.msra.mxu1 %v1409_v20 }
 0x149   :  { %v1187_v60 = vpop.f32.mrb[0].mxu0 }
 0x14a   :  { %v1188_v61 = vpop.f32.mrb[1].mxu0 }
 0x14b   :  { %v1209_v62 = vpop.f32.mrb[0].mxu1  ;;  %v1189_v63 = vadd.f32 %v1188_v61, %v1187_v60  ;;  %v1190_v0 = vpop.f32.mrb[2].mxu0 }
 0x14c   :  { %v1210_v1 = vpop.f32.mrb[1].mxu1  ;;  %v1191_v3 = vpop.f32.mrb[3].mxu0 }
 0x14d   :  { %v1211_v4 = vadd.f32 %v1210_v1, %v1209_v62  ;;  %v1212_v5 = vpop.f32.mrb[2].mxu1 }
 0x14e   :  { %v1213_v6 = vpop.f32.mrb[3].mxu1 }
 0x14f   :  { %v780_v7 = vadd.f32 %v1211_v4, %v1189_v63 }
 0x169   :  { %v1231_v8 = vpop.f32.mrb[4].mxu0 }
 0x16a   :  { %v1232_v9 = vpop.f32.mrb[5].mxu0 }
 0x16b   :  { %v1233_v10 = vadd.f32 %v1232_v9, %v1231_v8  ;;  %v1234_v11 = vpop.f32.mrb[6].mxu0  ;;  %v859_v12 = vpop.f32.mrb[4].mxu1 }
 0x16c   :  { %v1235_v13 = vpop.f32.mrb[7].mxu0  ;;  %v1282_v14 = vpop.f32.mrb[5].mxu1 }
 0x16d   :  { %v820_v15 = vadd.f32 %v1233_v10, %v780_v7  ;;  %v862_v2 = vpop.f32.mrb[6].mxu1 }
 0x16e   :  { %v1283_v16 = vpop.f32.mrb[7].mxu1 }
 0x16f   :  { %v860_v17 = vadd.f32 %v859_v12, %v820_v15 }
 0x171   :  { %v865_v18 = vmax.f32 %v860_v17, 0.0 }
 0x173   :  { %v866_v19 = vpack.c.bf16 %v865_v18, %v865_v18 }
 0x175   :  { %1301 = vmatmul.mubr.bf16.vlgmr.msra.gmra.mrb[8].mxu0 %v866_v19 }
 0x248   :  { %v965_v21 = vpop.f32.mrb[8].mxu0 }
 0x249   :  { %v971_v22 = vmax.f32 %v965_v21, 0.0  ;;  %v1302_v23 = vpop.f32.mrb[9].mxu0 }
 0x24a   :  { %v968_v24 = vpop.f32.mrb[10].mxu0 }
 0x24b   :  { %v972_v25 = vpack.c.bf16 %v971_v22, %v971_v22  ;;  %v1303_v26 = vpop.f32.mrb[11].mxu0 }
 0x24d   :  { %1321 = vmatmul.mubr.bf16.vlgmr.msra.gmra.mrb[8].mxu1 %v972_v25 }
 0x320   :  { %v1071_v27 = vpop.f32.mrb[8].mxu1 }
 0x321   :  { %1077 = vst [vmem:[#allocation11] sm:$0x3] %v1071_v27  ;;  %v1322_v28 = vpop.f32.mrb[9].mxu1 }
 0x322   :  { %v1074_v29 = vpop.f32.mrb[10].mxu1 }
 0x323   :  { %1509 = shalt.err (!%p1506_p8)
}
 0x324   :  { %s1510_s1 = scalar_lea.hbm %s1688_s4, 32 }
 0x325   :  { %p1511_p9 = scmp.ne.s32.totalorder %s1688_s4, %s1510_s1  ;;  %p1514_p10 = scmp.lt.u32.totalorder %s1510_s1, %s1688_s4 }
 0x327   :  { %p1516_p11 = pnand %p1514_p10, %p1511_p9 }
 0x329   :  { %1519 = shalt.err (!%p1516_p11)
}
 0x32a   :  { %1087 = dma.vmem_to_hbm [thread:$0]  %s1085_s25, 32, %s1688_s4, [#allocation5]   ;;  %v1323_v30 = vpop.f32.mrb[11].mxu1 }
 0x32b   :  { %1526 = dma.done.wait [#allocation5], 32  }
 0x32c   :  { %1527 = vsyncadd [#allocation5], 4294967264 }
 0x32d   :  { %1091 = vsyncpa [#allocation4], 1 }
 0x32e   :  { %1092 = vsyncpa [#allocation7], 1 }
 0x32f   :  { %1093 = vsyncpa [#allocation10], 1 }
 0x330   :  { %1094 = vsyncpa [#allocation5], 1 }

</bundles_post_ra>
